<compile_context>
chip_gen: v7x
topology: tpu7x:2x2x1
jax: 0.10.0
libtpu: 0.0.40
codegen_flags: <defaults>
</compile_context>

<pallas_src>
import functools

import jax
import jax.numpy as jnp
from jax import lax
from jax.experimental import pallas as pl
from jax.experimental.pallas import tpu as pltpu


F_PAD = 128                       # lane-dense output feature width
VMEM_LIMIT_BYTES = 32 * 1024 * 1024  # >= v5e's 16 MiB default; safe on v6e/v7x


def _round_up(x, m):
    return (x + m - 1) // m * m


def _choose_tiles(n):
    """Pick (tm, tk, n_pad) so that n_pad % tm == 0 and n_pad % tk == 0."""
    if n > 512:
        n_pad = _round_up(n, 512)
        return 256, 512, n_pad
    n_pad = _round_up(max(n, 1), 128)
    tk = n_pad
    tm = 256 if n_pad % 256 == 0 else 128
    tm = min(tm, n_pad)
    return tm, tk, n_pad


# --------------------------------------------------------------------------
# One GCNConv layer (normalization + self-loop folded in, A streamed in tiles)
#   grid = (N_pad // tm, N_pad // tk); reduction over k (last grid axis)
# --------------------------------------------------------------------------
def _gcn_layer_kernel(a_ref, xk_ref, xi_ref, dk_ref, di_ref, w_ref, b_ref,
                      o_ref, acc_ref, *, apply_relu):
    k = pl.program_id(1)

    @pl.when(k == 0)
    def _():
        acc_ref[...] = jnp.zeros_like(acc_ref)

    # y_k = dinv[source_tile] * (X[source_tile] @ W)     -- (tk, F_PAD) f32
    y_k = dk_ref[...] * jnp.dot(xk_ref[...], w_ref[...],
                                preferred_element_type=jnp.float32)
    # acc += A[row_tile, source_tile] @ y_k              -- bf16 x bf16 -> f32 on MXU
    acc_ref[...] += jnp.dot(a_ref[...], y_k.astype(a_ref.dtype),
                            preferred_element_type=jnp.float32)

    @pl.when(k == pl.num_programs(1) - 1)
    def _():
        # self-loop term: dinv_i^2 * (X_i @ W) == dinv_i * y_i
        y_i = di_ref[...] * jnp.dot(xi_ref[...], w_ref[...],
                                    preferred_element_type=jnp.float32)
        h = di_ref[...] * (acc_ref[...] + y_i) + b_ref[...]
        if apply_relu:
            h = jnp.maximum(h, 0.0)
        o_ref[...] = h.astype(o_ref.dtype)


def gcn_layer(a_bf16, x, dinv, w, b, *, tm, tk, apply_relu):
    """out(N_pad, F_PAD) = D^-1/2 (A+I) D^-1/2 (x @ w) + b  [+ ReLU], lane-padded."""
    n_pad, f_in = x.shape
    f_out = w.shape[1]
    assert f_out <= F_PAD and n_pad % tm == 0 and n_pad % tk == 0

    # Pad the (tiny) weight / bias to a lane-dense 128-wide output slab.
    w_pad = jnp.zeros((f_in, F_PAD), jnp.float32).at[:, :f_out].set(w)
    b_pad = jnp.zeros((1, F_PAD), jnp.float32).at[0, :f_out].set(b)

    kernel = functools.partial(_gcn_layer_kernel, apply_relu=apply_relu)
    grid = (n_pad // tm, n_pad // tk)

    return pl.pallas_call(
        kernel,
        out_shape=jax.ShapeDtypeStruct((n_pad, F_PAD), jnp.float32),
        grid_spec=pltpu.PrefetchScalarGridSpec(
            num_scalar_prefetch=0,
            grid=grid,
            in_specs=[
                pl.BlockSpec((tm, tk), lambda i, k: (i, k)),        # A (bf16), streamed
                pl.BlockSpec((tk, f_in), lambda i, k: (k, 0)),      # X (source rows)
                pl.BlockSpec((tm, f_in), lambda i, k: (i, 0)),      # X (target rows, self-loop)
                pl.BlockSpec((tk, 1), lambda i, k: (k, 0)),         # dinv (source)
                pl.BlockSpec((tm, 1), lambda i, k: (i, 0)),         # dinv (target)
                pl.BlockSpec((f_in, F_PAD), lambda i, k: (0, 0)),   # W (padded)
                pl.BlockSpec((1, F_PAD), lambda i, k: (0, 0)),      # b (padded)
            ],
            out_specs=pl.BlockSpec((tm, F_PAD), lambda i, k: (i, 0)),
            scratch_shapes=[pltpu.VMEM((tm, F_PAD), jnp.float32)],
        ),
        compiler_params=pltpu.CompilerParams(
            dimension_semantics=("parallel", "arbitrary"),
            vmem_limit_bytes=VMEM_LIMIT_BYTES,
        ),
    )(a_bf16, x, x, dinv, dinv, w_pad, b_pad)


# --------------------------------------------------------------------------
# Parameter init (same shapes as the PyTorch module)
# --------------------------------------------------------------------------
def init_params(key, in_channels, out_channels):
    h = 2 * out_channels
    shapes = {
        "conv1":       (in_channels, h),
        "conv2":       (h, h),
        "conv3":       (h, h),
        "conv_mu":     (h, out_channels),
        "conv_logstd": (h, out_channels),
    }
    params = {}
    for i, (name, (fi, fo)) in enumerate(shapes.items()):
        kw, _ = jax.random.split(jax.random.fold_in(key, i))
        scale = (6.0 / (fi + fo)) ** 0.5   # glorot-uniform like GCNConv
        params[name] = {
            "w": jax.random.uniform(kw, (fi, fo), jnp.float32, -scale, scale),
            "b": jnp.zeros((fo,), jnp.float32),
        }
    return params


# --------------------------------------------------------------------------
# VariationalGCNEncoder forward (Pallas-backed)
# --------------------------------------------------------------------------
def variational_gcn_encoder_forward(params, X, edge_index, edge_weight, depth):
    # NOTE: symmetric normalization here uses the (target) in-degree for both
    # scalings; this matches PyG GCNConv exactly when the weighted adjacency is
    # symmetric (undirected graph), as in this example.
    n, f_in = X.shape
    out_channels = params["conv_mu"]["w"].shape[1]
    h = params["conv1"]["w"].shape[1]
    tm, tk, n_pad = _choose_tiles(n)

    src, dst = edge_index[0], edge_index[1]

    # Dense adjacency A[target, source] at padded size, streamed in bf16.
    # (Self loops are NOT added here; they are folded into the kernel analytically.)
    adj = jnp.zeros((n_pad, n_pad), jnp.float32).at[dst, src].add(edge_weight)
    a_bf16 = adj.astype(jnp.bfloat16)

    # dinv = (deg + 1)^-1/2, computed O(E) from the edge list (self-loop weight 1).
    deg = jnp.zeros((n,), jnp.float32).at[dst].add(edge_weight) + 1.0
    dinv = jnp.where(deg > 0.0, lax.rsqrt(deg), 0.0)
    dinv_pad = jnp.zeros((n_pad, 1), jnp.float32).at[:n, 0].set(dinv)

    x = jnp.zeros((n_pad, f_in), jnp.float32).at[:n].set(X)

    x = gcn_layer(a_bf16, x, dinv_pad, params["conv1"]["w"], params["conv1"]["b"],
                  tm=tm, tk=tk, apply_relu=True)[:, :h]
    if depth >= 2:
        x = gcn_layer(a_bf16, x, dinv_pad, params["conv2"]["w"], params["conv2"]["b"],
                      tm=tm, tk=tk, apply_relu=True)[:, :h]
    if depth == 3:
        x = gcn_layer(a_bf16, x, dinv_pad, params["conv3"]["w"], params["conv3"]["b"],
                      tm=tm, tk=tk, apply_relu=True)[:, :h]

    # Fused mu / logstd head: one pass over the N^2 adjacency instead of two.
    w_ms = jnp.concatenate([params["conv_mu"]["w"], params["conv_logstd"]["w"]], axis=1)
    b_ms = jnp.concatenate([params["conv_mu"]["b"], params["conv_logstd"]["b"]], axis=0)
    out = gcn_layer(a_bf16, x, dinv_pad, w_ms, b_ms, tm=tm, tk=tk, apply_relu=False)

    mu = out[:n, :out_channels]
    logstd = out[:n, out_channels:2 * out_channels]
    return mu, logstd


if __name__ == "__main__":
    key = jax.random.PRNGKey(0)

    # Small synthetic graph: N nodes on an undirected ring, unit edge weights.
    num_nodes = 16
    in_channels = 8
    out_channels = 8
    depth = 3

    k_x, k_p = jax.random.split(key)
    X = jax.random.normal(k_x, (num_nodes, in_channels), jnp.float32)

    i = jnp.arange(num_nodes, dtype=jnp.int32)
    j = (i + 1) % num_nodes
    src = jnp.concatenate([i, j])
    dst = jnp.concatenate([j, i])
    edge_index = jnp.stack([src, dst], axis=0)           # (2, 2N) undirected
    edge_weight = jnp.ones((edge_index.shape[1],), jnp.float32)

    params = init_params(k_p, in_channels, out_channels)

    mu, logstd = variational_gcn_encoder_forward(
        params, X, edge_index, edge_weight, depth)
    jax.block_until_ready((mu, logstd))

    assert mu.shape == (num_nodes, out_channels)
    assert logstd.shape == (num_nodes, out_channels)
    assert jnp.all(jnp.isfinite(mu)) and jnp.all(jnp.isfinite(logstd))
    print("KERNEL_OK")
</pallas_src>

<mosaic_0001>
module attributes {stable_mosaic.version = 11 : i64} {
  func.func @_gcn_layer_kernel(%arg0: i32, %arg1: i32, %arg2: memref<128x128xbf16, #tpu.memory_space<vmem>>, %arg3: memref<128x8xf32, #tpu.memory_space<vmem>>, %arg4: memref<128x8xf32, #tpu.memory_space<vmem>>, %arg5: memref<128x1xf32, #tpu.memory_space<vmem>>, %arg6: memref<128x1xf32, #tpu.memory_space<vmem>>, %arg7: memref<8x128xf32, #tpu.memory_space<vmem>>, %arg8: memref<1x128xf32, #tpu.memory_space<vmem>>, %arg9: memref<128x128xf32, #tpu.memory_space<vmem>>, %arg10: memref<128x128xf32, #tpu.memory_space<vmem>>) attributes {dimension_semantics = [#tpu.dimension_semantics<parallel>, #tpu.dimension_semantics<arbitrary>], iteration_bounds = array<i64: 1, 1>, scalar_prefetch = 0 : i64, scratch_operands = 1 : i64, tpu.core_type = #tpu.core_type<tc>, window_params = [{transform_indices = @transform_0, window_bounds = array<i64: 128, 128>}, {transform_indices = @transform_1, window_bounds = array<i64: 128, 8>}, {transform_indices = @transform_2, window_bounds = array<i64: 128, 8>}, {transform_indices = @transform_3, window_bounds = array<i64: 128, 1>}, {transform_indices = @transform_4, window_bounds = array<i64: 128, 1>}, {pipeline_mode = #tpu.pipeline_mode<synchronous>, transform_indices = @transform_5, window_bounds = array<i64: 8, 128>}, {pipeline_mode = #tpu.pipeline_mode<synchronous>, transform_indices = @transform_6, window_bounds = array<i64: 1, 128>}, {transform_indices = @transform_7, window_bounds = array<i64: 128, 128>}]} {
    %c0_i32 = arith.constant 0 : i32
    %0 = arith.cmpi eq, %arg1, %c0_i32 : i32
    %1 = arith.extui %0 : i1 to i32
    %c0_i32_0 = arith.constant 0 : i32
    %2 = arith.cmpi ne, %1, %c0_i32_0 : i32
    scf.if %2 {
      %cst_15 = arith.constant 0.000000e+00 : f32
      %18 = vector.broadcast %cst_15 : f32 to vector<128x128xf32>
      %c0_16 = arith.constant 0 : index
      %c0_17 = arith.constant 0 : index
      %19 = vector.load %arg10[%c0_16, %c0_17] : memref<128x128xf32, #tpu.memory_space<vmem>>, vector<128x128xf32>
      tpu.vector_store %arg10[%c0_16, %c0_17], %18 {strides = array<i32>} : memref<128x128xf32, #tpu.memory_space<vmem>>, vector<128x128xf32>,
    } else {
    }
    %c0 = arith.constant 0 : index
    %c0_1 = arith.constant 0 : index
    %3 = vector.load %arg5[%c0, %c0_1] : memref<128x1xf32, #tpu.memory_space<vmem>>, vector<128x1xf32>
    %c0_2 = arith.constant 0 : index
    %c0_3 = arith.constant 0 : index
    %4 = vector.load %arg3[%c0_2, %c0_3] : memref<128x8xf32, #tpu.memory_space<vmem>>, vector<128x8xf32>
    %c0_4 = arith.constant 0 : index
    %c0_5 = arith.constant 0 : index
    %5 = vector.load %arg7[%c0_4, %c0_5] : memref<8x128xf32, #tpu.memory_space<vmem>>, vector<8x128xf32>
    %cst = arith.constant dense<0.000000e+00> : vector<128x128xf32>
    %6 = tpu.matmul %4, %5, %cst {dimension_numbers = #tpu.dot_dimension_numbers<[1], [0], [0], [1], [0, 0, 1, 1], [], []>} : vector<128x8xf32>, vector<8x128xf32>, vector<128x128xf32> -> vector<128x128xf32>
    %7 = vector.broadcast %3 : vector<128x1xf32> to vector<128x128xf32>
    %8 = arith.mulf %7, %6 : vector<128x128xf32>
    %c0_6 = arith.constant 0 : index
    %c0_7 = arith.constant 0 : index
    %9 = vector.load %arg10[%c0_6, %c0_7] : memref<128x128xf32, #tpu.memory_space<vmem>>, vector<128x128xf32>
    %c0_8 = arith.constant 0 : index
    %c0_9 = arith.constant 0 : index
    %10 = vector.load %arg2[%c0_8, %c0_9] : memref<128x128xbf16, #tpu.memory_space<vmem>>, vector<128x128xbf16>
    %11 = arith.truncf %8 : vector<128x128xf32> to vector<128x128xbf16>
    %cst_10 = arith.constant dense<0.000000e+00> : vector<128x128xf32>
    %12 = tpu.matmul %10, %11, %cst_10 {dimension_numbers = #tpu.dot_dimension_numbers<[1], [0], [0], [1], [0, 0, 1, 1], [], []>} : vector<128x128xbf16>, vector<128x128xbf16>, vector<128x128xf32> -> vector<128x128xf32>
    %13 = arith.addf %9, %12 : vector<128x128xf32>
    %c0_11 = arith.constant 0 : index
    %c0_12 = arith.constant 0 : index
    %14 = vector.load %arg10[%c0_11, %c0_12] : memref<128x128xf32, #tpu.memory_space<vmem>>, vector<128x128xf32>
    tpu.vector_store %arg10[%c0_11, %c0_12], %13 {strides = array<i32>} : memref<128x128xf32, #tpu.memory_space<vmem>>, vector<128x128xf32>,
    %c0_i32_13 = arith.constant 0 : i32
    %15 = arith.cmpi eq, %arg1, %c0_i32_13 : i32
    %16 = arith.extui %15 : i1 to i32
    %c0_i32_14 = arith.constant 0 : i32
    %17 = arith.cmpi ne, %16, %c0_i32_14 : i32
    scf.if %17 {
      %c0_15 = arith.constant 0 : index
      %c0_16 = arith.constant 0 : index
      %18 = vector.load %arg6[%c0_15, %c0_16] : memref<128x1xf32, #tpu.memory_space<vmem>>, vector<128x1xf32>
      %c0_17 = arith.constant 0 : index
      %c0_18 = arith.constant 0 : index
      %19 = vector.load %arg4[%c0_17, %c0_18] : memref<128x8xf32, #tpu.memory_space<vmem>>, vector<128x8xf32>
      %c0_19 = arith.constant 0 : index
      %c0_20 = arith.constant 0 : index
      %20 = vector.load %arg7[%c0_19, %c0_20] : memref<8x128xf32, #tpu.memory_space<vmem>>, vector<8x128xf32>
      %cst_21 = arith.constant dense<0.000000e+00> : vector<128x128xf32>
      %21 = tpu.matmul %19, %20, %cst_21 {dimension_numbers = #tpu.dot_dimension_numbers<[1], [0], [0], [1], [0, 0, 1, 1], [], []>} : vector<128x8xf32>, vector<8x128xf32>, vector<128x128xf32> -> vector<128x128xf32>
      %22 = vector.broadcast %18 : vector<128x1xf32> to vector<128x128xf32>
      %23 = arith.mulf %22, %21 : vector<128x128xf32>
      %c0_22 = arith.constant 0 : index
      %c0_23 = arith.constant 0 : index
      %24 = vector.load %arg6[%c0_22, %c0_23] : memref<128x1xf32, #tpu.memory_space<vmem>>, vector<128x1xf32>
      %c0_24 = arith.constant 0 : index
      %c0_25 = arith.constant 0 : index
      %25 = vector.load %arg10[%c0_24, %c0_25] : memref<128x128xf32, #tpu.memory_space<vmem>>, vector<128x128xf32>
      %26 = arith.addf %25, %23 : vector<128x128xf32>
      %27 = vector.broadcast %24 : vector<128x1xf32> to vector<128x128xf32>
      %28 = arith.mulf %27, %26 : vector<128x128xf32>
      %c0_26 = arith.constant 0 : index
      %c0_27 = arith.constant 0 : index
      %29 = vector.load %arg8[%c0_26, %c0_27] : memref<1x128xf32, #tpu.memory_space<vmem>>, vector<1x128xf32>
      %30 = vector.broadcast %29 : vector<1x128xf32> to vector<128x128xf32>
      %31 = arith.addf %28, %30 : vector<128x128xf32>
      %cst_28 = arith.constant 0.000000e+00 : f32
      %32 = vector.broadcast %cst_28 : f32 to vector<128x128xf32>
      %33 = arith.maximumf %31, %32 : vector<128x128xf32>
      %c0_29 = arith.constant 0 : index
      %c0_30 = arith.constant 0 : index
      %34 = vector.load %arg9[%c0_29, %c0_30] : memref<128x128xf32, #tpu.memory_space<vmem>>, vector<128x128xf32>
      tpu.vector_store %arg9[%c0_29, %c0_30], %33 {strides = array<i32>} : memref<128x128xf32, #tpu.memory_space<vmem>>, vector<128x128xf32>,
    } else {
    }
    return
  }
  func.func @transform_0(%arg0: i32, %arg1: i32) -> (i32, i32) {
    %c0_i32 = arith.constant 0 : i32
    return %arg0, %arg1 : i32, i32
  }
  func.func @transform_1(%arg0: i32, %arg1: i32) -> (i32, i32) {
    %c0_i32 = arith.constant 0 : i32
    %c0_i32_0 = arith.constant 0 : i32
    return %arg1, %c0_i32 : i32, i32
  }
  func.func @transform_2(%arg0: i32, %arg1: i32) -> (i32, i32) {
    %c0_i32 = arith.constant 0 : i32
    %c0_i32_0 = arith.constant 0 : i32
    return %arg0, %c0_i32 : i32, i32
  }
  func.func @transform_3(%arg0: i32, %arg1: i32) -> (i32, i32) {
    %c0_i32 = arith.constant 0 : i32
    %c0_i32_0 = arith.constant 0 : i32
    return %arg1, %c0_i32 : i32, i32
  }
  func.func @transform_4(%arg0: i32, %arg1: i32) -> (i32, i32) {
    %c0_i32 = arith.constant 0 : i32
    %c0_i32_0 = arith.constant 0 : i32
    return %arg0, %c0_i32 : i32, i32
  }
  func.func @transform_5(%arg0: i32, %arg1: i32) -> (i32, i32) {
    %c0_i32 = arith.constant 0 : i32
    %c0_i32_0 = arith.constant 0 : i32
    %c0_i32_1 = arith.constant 0 : i32
    return %c0_i32, %c0_i32_0 : i32, i32
  }
  func.func @transform_6(%arg0: i32, %arg1: i32) -> (i32, i32) {
    %c0_i32 = arith.constant 0 : i32
    %c0_i32_0 = arith.constant 0 : i32
    %c0_i32_1 = arith.constant 0 : i32
    return %c0_i32, %c0_i32_0 : i32, i32
  }
  func.func @transform_7(%arg0: i32, %arg1: i32) -> (i32, i32) {
    %c0_i32 = arith.constant 0 : i32
    %c0_i32_0 = arith.constant 0 : i32
    return %arg0, %c0_i32 : i32, i32
  }
}

</mosaic_0001>

<bundles_post_ra>
// kernel: tpu_custom_call.1
= control target key start
LH: loop header
LB: loop body
LE: loop exit
PB: predicated region body
PF: predicated region fallthrough
CT: control target
= control target key end

     0   :  { %vm81_vm0 = vcmask 64512   ;;  %v1245_v4 = vmov 0   ;;  %s1604_s0 = inlined_call_operand.vmem [shape: bf16[128,128], index: 0, kind: input, shape index: {}]   ;;  %s1605_s1 = inlined_call_operand.vmem [shape: f32[128,8], index: 1, kind: input, shape index: {}]   ;;  %s1606_s2 = inlined_call_operand.vmem [shape: f32[128,8], index: 2, kind: input, shape index: {}]   ;;  %s1607_s3 = inlined_call_operand.vmem [shape: f32[128,1], index: 3, kind: input, shape index: {}]   ;;  %s1608_s4 = inlined_call_operand.vmem [shape: f32[128,1], index: 4, kind: input, shape index: {}]   ;;  %s1609_s5 = inlined_call_operand.vmem [shape: f32[8,128], index: 5, kind: input, shape index: {}]   ;;  %s1610_s6 = inlined_call_operand.vmem [shape: f32[1,128], index: 6, kind: input, shape index: {}]   ;;  %s1611_s7 = inlined_call_operand.hbm [shape: f32[128,128], index: 7, kind: output, shape index: {}]  }
   0x1   :  { %v80_v0 = vld [vmem:[%s1609_s5] sm:$0xff]  ;;  %v65_v2 = vld [vmem:[%s1605_s1 + $0x8] sm:$0xff]  ;;  %v66_v3 = vld [vmem:[%s1605_s1 + $0x10] sm:$0xff]  ;;  %1211 = vset.pattern.permute.xlu0 %v1245_v4  ;;  %1212 = vset.pattern.permute.xlu1 %v1245_v4 }
   0x2   :  { %v64_v1 = vld [vmem:[%s1605_s1] sm:$0xff]  ;;  %1123 = vmatprep.subr.mxu0 %v80_v0  ;;  %v67_v5 = vld [vmem:[%s1605_s1 + $0x18] sm:$0xff]  ;;  %v50_v8 = vld [vmem:[%s1607_s3 + $0x10] sm:$0xff] }
   0x3   :  { %1125 = vmatprep.mubr.msk.f32.mxu0 %vm81_vm0, %v64_v1  ;;  %1124 = vmatpush3.msra.mxu0 %v80_v0  ;;  %v48_v6 = vld [vmem:[%s1607_s3] sm:$0xff]  ;;  %v49_v9 = vld [vmem:[%s1607_s3 + $0x8] sm:$0xff]  ;;  %v51_v10 = vld [vmem:[%s1607_s3 + $0x18] sm:$0xff] }
   0x4   :  { %1126 = vmatmul.mubr.msk.f32.vlgmr.msra.gmra.mrb[0].mxu0 %vm81_vm0, %v65_v2  ;;  %1181 = vmatprep.subr.mxu0 %v80_v0  ;;  %v68_v7 = vld [vmem:[%s1605_s1 + $0x20] sm:$0xff]  ;;  %v69_v11 = vld [vmem:[%s1605_s1 + $0x28] sm:$0xff]  ;;  %v70_v12 = vld [vmem:[%s1605_s1 + $0x30] sm:$0xff] }
   0x5   :  { %1128 = vmatprep.mubr.msk.f32.mxu0 %vm81_vm0, %v66_v3  ;;  %277 = vperm.xlu0 %1211, %v48_v6   ;;  %v52_v13 = vld [vmem:[%s1607_s3 + $0x20] sm:$0xff]  ;;  %v53_v14 = vld [vmem:[%s1607_s3 + $0x28] sm:$0xff]  ;;  %v71_v15 = vld [vmem:[%s1605_s1 + $0x38] sm:$0xff] }
   0x6   :  { %1182 = vmatpush3.msra.mxu0 %v80_v0  ;;  %287 = vperm.xlu1 %1212, %v50_v8   ;;  %v72_v16 = vld [vmem:[%s1605_s1 + $0x40] sm:$0xff]  ;;  %v54_v17 = vld [vmem:[%s1607_s3 + $0x30] sm:$0xff]  ;;  %v55_v18 = vld [vmem:[%s1607_s3 + $0x38] sm:$0xff] }
   0x7   :  { %v73_v19 = vld [vmem:[%s1605_s1 + $0x48] sm:$0xff]  ;;  %v74_v20 = vld [vmem:[%s1605_s1 + $0x50] sm:$0xff]  ;;  %v56_v21 = vld [vmem:[%s1607_s3 + $0x40] sm:$0xff] }
   0x8   :  { %1129 = vmatmul.mubr.msk.f32.gmra.mrb[2].mxu0 %vm81_vm0, %v67_v5  ;;  %v57_v22 = vld [vmem:[%s1607_s3 + $0x48] sm:$0xff]  ;;  %v75_v23 = vld [vmem:[%s1605_s1 + $0x58] sm:$0xff]  ;;  %v76_v24 = vld [vmem:[%s1605_s1 + $0x60] sm:$0xff] }
   0x9   :  { %1131 = vmatprep.mubr.msk.f32.mxu0 %vm81_vm0, %v68_v7  ;;  %282 = vperm.xlu0 %1211, %v49_v9   ;;  %v58_v25 = vld [vmem:[%s1607_s3 + $0x50] sm:$0xff]  ;;  %v59_v26 = vld [vmem:[%s1607_s3 + $0x58] sm:$0xff]  ;;  %v77_v27 = vld [vmem:[%s1605_s1 + $0x68] sm:$0xff] }
   0xa   :  { %292 = vperm.xlu1 %1212, %v51_v10   ;;  %v78_v28 = vld [vmem:[%s1605_s1 + $0x70] sm:$0xff]  ;;  %v60_v29 = vld [vmem:[%s1607_s3 + $0x60] sm:$0xff]  ;;  %v61_v30 = vld [vmem:[%s1607_s3 + $0x68] sm:$0xff] }
   0xc   :  { %1132 = vmatmul.mubr.msk.f32.gmra.mrb[4].mxu0 %vm81_vm0, %v69_v11 }
   0xd   :  { %1134 = vmatprep.mubr.msk.f32.mxu0 %vm81_vm0, %v70_v12  ;;  %297 = vperm.xlu0 %1211, %v52_v13  }
   0xe   :  { %302 = vperm.xlu1 %1212, %v53_v14  }
  0x10   :  { %1135 = vmatmul.mubr.msk.f32.gmra.mrb[6].mxu0 %vm81_vm0, %v71_v15 }
  0x11   :  { %1137 = vmatprep.mubr.msk.f32.mxu0 %vm81_vm0, %v72_v16  ;;  %307 = vperm.xlu0 %1211, %v54_v17  }
  0x12   :  { %312 = vperm.xlu1 %1212, %v55_v18  }
  0x14   :  { %1138 = vmatmul.mubr.msk.f32.gmra.mrb[8].mxu0 %vm81_vm0, %v73_v19 }
  0x15   :  { %1140 = vmatprep.mubr.msk.f32.mxu0 %vm81_vm0, %v74_v20  ;;  %317 = vperm.xlu0 %1211, %v56_v21  }
  0x16   :  { %322 = vperm.xlu1 %1212, %v57_v22  }
  0x18   :  { %1141 = vmatmul.mubr.msk.f32.gmra.mrb[10].mxu0 %vm81_vm0, %v75_v23 }
  0x19   :  { %1143 = vmatprep.mubr.msk.f32.mxu0 %vm81_vm0, %v76_v24  ;;  %327 = vperm.xlu0 %1211, %v58_v25  }
  0x1a   :  { %332 = vperm.xlu1 %1212, %v59_v26  }
  0x1c   :  { %1144 = vmatmul.mubr.msk.f32.gmra.mrb[12].mxu0 %vm81_vm0, %v77_v27 }
  0x1d   :  { %12 = vsyncpa [#allocation4], 0  ;;  %1146 = vmatprep.mubr.msk.f32.mxu0 %vm81_vm0, %v78_v28  ;;  %v79_v31 = vld [vmem:[%s1605_s1 + $0x78] sm:$0xff]  ;;  %v607_v32 = vld [vmem:[%s1606_s2] sm:$0xff]  ;;  %337 = vperm.xlu0 %1211, %v60_v29  }
  0x1e   :  { %342 = vperm.xlu1 %1212, %v61_v30   ;;  %v62_v33 = vld [vmem:[%s1607_s3 + $0x70] sm:$0xff]  ;;  %v63_v34 = vld [vmem:[%s1607_s3 + $0x78] sm:$0xff]  ;;  %v608_v35 = vld [vmem:[%s1606_s2 + $0x8] sm:$0xff] }
  0x1f   :  { %v609_v36 = vld [vmem:[%s1606_s2 + $0x10] sm:$0xff]  ;;  %v591_v37 = vld [vmem:[%s1608_s4] sm:$0xff]  ;;  %v592_v38 = vld [vmem:[%s1608_s4 + $0x8] sm:$0xff] }
  0x20   :  { %1147 = vmatmul.mubr.msk.f32.gmra.mrb[14].mxu0 %vm81_vm0, %v79_v31  ;;  %v610_v39 = vld [vmem:[%s1606_s2 + $0x18] sm:$0xff]  ;;  %v611_v40 = vld [vmem:[%s1606_s2 + $0x20] sm:$0xff]  ;;  %v593_v41 = vld [vmem:[%s1608_s4 + $0x10] sm:$0xff] }
  0x21   :  { %1183 = vmatprep.mubr.msk.f32.mxu0 %vm81_vm0, %v607_v32  ;;  %347 = vperm.xlu0 %1211, %v62_v33   ;;  %v594_v42 = vld [vmem:[%s1608_s4 + $0x18] sm:$0xff]  ;;  %v612_v43 = vld [vmem:[%s1606_s2 + $0x28] sm:$0xff]  ;;  %v613_v44 = vld [vmem:[%s1606_s2 + $0x30] sm:$0xff] }
  0x22   :  { %352 = vperm.xlu1 %1212, %v63_v34   ;;  %v595_v45 = vld [vmem:[%s1608_s4 + $0x20] sm:$0xff]  ;;  %v596_v46 = vld [vmem:[%s1608_s4 + $0x28] sm:$0xff]  ;;  %v614_v47 = vld [vmem:[%s1606_s2 + $0x38] sm:$0xff] }
  0x23   :  { %v615_v48 = vld [vmem:[%s1606_s2 + $0x40] sm:$0xff]  ;;  %v597_v49 = vld [vmem:[%s1608_s4 + $0x30] sm:$0xff]  ;;  %v598_v50 = vld [vmem:[%s1608_s4 + $0x38] sm:$0xff] }
  0x24   :  { %1184 = vmatmul.mubr.msk.f32.vlgmr.msra.gmra.mrb[16].mxu0 %vm81_vm0, %v608_v35  ;;  %v616_v51 = vld [vmem:[%s1606_s2 + $0x48] sm:$0xff]  ;;  %v617_v52 = vld [vmem:[%s1606_s2 + $0x50] sm:$0xff]  ;;  %v599_v53 = vld [vmem:[%s1608_s4 + $0x40] sm:$0xff] }
  0x25   :  { %1186 = vmatprep.mubr.msk.f32.mxu0 %vm81_vm0, %v609_v36  ;;  %819 = vperm.xlu0 %1211, %v591_v37   ;;  %v600_v54 = vld [vmem:[%s1608_s4 + $0x48] sm:$0xff]  ;;  %v618_v55 = vld [vmem:[%s1606_s2 + $0x58] sm:$0xff]  ;;  %v619_v56 = vld [vmem:[%s1606_s2 + $0x60] sm:$0xff] }
  0x26   :  { %824 = vperm.xlu1 %1212, %v592_v38   ;;  %v601_v57 = vld [vmem:[%s1608_s4 + $0x50] sm:$0xff]  ;;  %v602_v58 = vld [vmem:[%s1608_s4 + $0x58] sm:$0xff]  ;;  %v620_v59 = vld [vmem:[%s1606_s2 + $0x68] sm:$0xff] }
  0x27   :  { %v621_v60 = vld [vmem:[%s1606_s2 + $0x70] sm:$0xff]  ;;  %v603_v61 = vld [vmem:[%s1608_s4 + $0x60] sm:$0xff]  ;;  %v604_v62 = vld [vmem:[%s1608_s4 + $0x68] sm:$0xff] }
  0x28   :  { %1187 = vmatmul.mubr.msk.f32.gmra.mrb[18].mxu0 %vm81_vm0, %v610_v39  ;;  %v622_v63 = vld [vmem:[%s1606_s2 + $0x78] sm:$0xff]  ;;  %v605_v0 = vld [vmem:[%s1608_s4 + $0x70] sm:$0xff]  ;;  %v1213_v2 = vld [vmem:[%s1604_s0] sm:$0xff]  }
  0x29   :  { %1189 = vmatprep.mubr.msk.f32.mxu0 %vm81_vm0, %v611_v40  ;;  %829 = vperm.xlu0 %1211, %v593_v41   ;;  %v606_v1 = vld [vmem:[%s1608_s4 + $0x78] sm:$0xff] }
  0x2a   :  { %834 = vperm.xlu1 %1212, %v594_v42   ;;  %1165 = vmatprep.mubr.bf16.mxu1 %v1213_v2 }
  0x2c   :  { %1190 = vmatmul.mubr.msk.f32.gmra.mrb[20].mxu0 %vm81_vm0, %v612_v43 }
  0x2d   :  { %1192 = vmatprep.mubr.msk.f32.mxu0 %vm81_vm0, %v613_v44  ;;  %839 = vperm.xlu0 %1211, %v595_v45  }
  0x2e   :  { %844 = vperm.xlu1 %1212, %v596_v46  }
  0x30   :  { %1193 = vmatmul.mubr.msk.f32.gmra.mrb[22].mxu0 %vm81_vm0, %v614_v47 }
  0x31   :  { %1195 = vmatprep.mubr.msk.f32.mxu0 %vm81_vm0, %v615_v48  ;;  %849 = vperm.xlu0 %1211, %v597_v49  }
  0x32   :  { %854 = vperm.xlu1 %1212, %v598_v50  }
  0x34   :  { %1196 = vmatmul.mubr.msk.f32.gmra.mrb[24].mxu0 %vm81_vm0, %v616_v51 }
  0x35   :  { %1198 = vmatprep.mubr.msk.f32.mxu0 %vm81_vm0, %v617_v52  ;;  %859 = vperm.xlu0 %1211, %v599_v53  }
  0x36   :  { %864 = vperm.xlu1 %1212, %v600_v54  }
  0x38   :  { %1199 = vmatmul.mubr.msk.f32.gmra.mrb[26].mxu0 %vm81_vm0, %v618_v55 }
  0x39   :  { %1201 = vmatprep.mubr.msk.f32.mxu0 %vm81_vm0, %v619_v56  ;;  %869 = vperm.xlu0 %1211, %v601_v57  }
  0x3a   :  { %874 = vperm.xlu1 %1212, %v602_v58  }
  0x3c   :  { %1202 = vmatmul.mubr.msk.f32.gmra.mrb[28].mxu0 %vm81_vm0, %v620_v59 }
  0x3d   :  { %1204 = vmatprep.mubr.msk.f32.mxu0 %vm81_vm0, %v621_v60  ;;  %879 = vperm.xlu0 %1211, %v603_v61   ;;  %v1214_v61 = vld [vmem:[%s1604_s0 + $0x8] sm:$0xff]  }
  0x3e   :  { %884 = vperm.xlu1 %1212, %v604_v62   ;;  %v1215_v62 = vld [vmem:[%s1604_s0 + $0x10] sm:$0xff]  }
  0x40   :  { %1205 = vmatmul.mubr.msk.f32.gmra.mrb[30].mxu0 %vm81_vm0, %v622_v63 }
  0x41   :  { %889 = vperm.xlu0 %1211, %v605_v0  }
  0x42   :  { %894 = vperm.xlu1 %1212, %v606_v1  }
  0x84   :  { %v278_v4 = vpop.permute.xlu0 %277 }
  0x85   :  { %v288_v3 = vpop.permute.xlu1 %287 }
  0x88   :  { %v283_v6 = vpop.permute.xlu0 %282 }
  0x89   :  { %v293_v5 = vpop.permute.xlu1 %292 }
  0x8c   :  { %v298_v8 = vpop.permute.xlu0 %297 }
  0x8d   :  { %v303_v7 = vpop.permute.xlu1 %302 }
  0x90   :  { %v308_v16 = vpop.permute.xlu0 %307 }
  0x91   :  { %v313_v13 = vpop.permute.xlu1 %312 }
  0x94   :  { %v318_v26 = vpop.permute.xlu0 %317 }
  0x95   :  { %v323_v24 = vpop.permute.xlu1 %322 }
  0x98   :  { %v328_v35 = vpop.permute.xlu0 %327 }
  0x99   :  { %v333_v32 = vpop.permute.xlu1 %332 }
  0x9c   :  { %v338_v45 = vpop.permute.xlu0 %337 }
  0x9d   :  { %v343_v43 = vpop.permute.xlu1 %342 }
  0xa0   :  { %v348_v54 = vpop.permute.xlu0 %347 }
  0xa1   :  { %v353_v51 = vpop.permute.xlu1 %352 }
  0xd7   :  { %v1127_v9 = vpop.f32.mrb[0].mxu0 }
  0xd8   :  { %v356_v10 = vmul.f32 %v1127_v9, %v283_v6  ;;  %v196_v11 = vpop.f32.mrb[1].mxu0  ;;  %v1218_v9 = vld [vmem:[%s1604_s0 + $0x28] sm:$0xff]  }
  0xd9   :  { %v355_v12 = vmul.f32 %v278_v4, %v196_v11  ;;  %v1217_v4 = vld [vmem:[%s1604_s0 + $0x20] sm:$0xff]  }
  0xdb   :  { %v1130_v14 = vpop.f32.mrb[2].mxu0  ;;  %v403_v15 = vpack.c.bf16 %v356_v10, %v355_v12  ;;  %v1219_v10 = vld [vmem:[%s1604_s0 + $0x30] sm:$0xff]  }
  0xdc   :  { %v358_v17 = vmul.f32 %v1130_v14, %v293_v5  ;;  %v206_v18 = vpop.f32.mrb[3].mxu0 }
  0xdd   :  { %v357_v19 = vmul.f32 %v288_v3, %v206_v18  ;;  %1149 = vmatprep.subr.bf16.mxu1 %v403_v15  ;;  %v1216_v3 = vld [vmem:[%s1604_s0 + $0x18] sm:$0xff]   ;;  %v820_v18 = vpop.permute.xlu0 %819 }
  0xde   :  { %1150 = vmatpush3.bf16.msra.mxu1 %v403_v15  ;;  %v1220_v15 = vld [vmem:[%s1604_s0 + $0x38] sm:$0xff]  }
  0xdf   :  { %v404_v20 = vpack.c.bf16 %v358_v17, %v357_v19  ;;  %v1133_v21 = vpop.f32.mrb[4].mxu0  ;;  %v825_v19 = vpop.permute.xlu1 %824 }
  0xe0   :  { %v360_v22 = vmul.f32 %v1133_v21, %v303_v7  ;;  %v216_v23 = vpop.f32.mrb[5].mxu0 }
  0xe1   :  { %v359_v25 = vmul.f32 %v298_v8, %v216_v23  ;;  %1151 = vmatprep.subr.bf16.mxu1 %v404_v20 }
  0xe2   :  { %1152 = vmatpush3.bf16.msra.mxu1 %v404_v20  ;;  %v830_v20 = vpop.permute.xlu0 %829 }
  0xe3   :  { %v405_v27 = vpack.c.bf16 %v360_v22, %v359_v25  ;;  %v1136_v28 = vpop.f32.mrb[6].mxu0  ;;  %v835_v21 = vpop.permute.xlu1 %834 }
  0xe4   :  { %v362_v29 = vmul.f32 %v1136_v28, %v313_v13  ;;  %v226_v30 = vpop.f32.mrb[7].mxu0 }
  0xe5   :  { %v361_v31 = vmul.f32 %v308_v16, %v226_v30  ;;  %1153 = vmatprep.subr.bf16.mxu1 %v405_v27 }
  0xe6   :  { %1154 = vmatpush3.bf16.msra.mxu1 %v405_v27  ;;  %v840_v22 = vpop.permute.xlu0 %839 }
  0xe7   :  { %v406_v33 = vpack.c.bf16 %v362_v29, %v361_v31  ;;  %v1139_v34 = vpop.f32.mrb[8].mxu0  ;;  %v845_v23 = vpop.permute.xlu1 %844 }
  0xe8   :  { %v364_v36 = vmul.f32 %v1139_v34, %v323_v24  ;;  %v236_v37 = vpop.f32.mrb[9].mxu0 }
  0xe9   :  { %v363_v38 = vmul.f32 %v318_v26, %v236_v37  ;;  %1155 = vmatprep.subr.bf16.mxu1 %v406_v33 }
  0xea   :  { %1156 = vmatpush3.bf16.msra.mxu1 %v406_v33  ;;  %v850_v24 = vpop.permute.xlu0 %849  ;;  %v1561_v33 = vld [vmem:[%s1610_s6] ss:$0 sm:$0xff]  ;;  %s1246_s6 = smov [#allocation3]  }
  0xeb   :  { %v407_v39 = vpack.c.bf16 %v364_v36, %v363_v38  ;;  %v1142_v40 = vpop.f32.mrb[10].mxu0  ;;  %v855_v26 = vpop.permute.xlu1 %854  ;;  %s1021_s19 = sshll.u32 %s1246_s6, 4  ;;  %s1022_s19 = int_to_ptr.vmem [resolvable:$true] %s1021_s19 }
  0xec   :  { %v366_v41 = vmul.f32 %v1142_v40, %v333_v32  ;;  %v246_v42 = vpop.f32.mrb[11].mxu0  ;;  %s1221_s20 = scalar_lea.vmem %s1022_s19, 2048  ;;  %p1226_p1 = scmp.lt.s32.totalorder %s1022_s19, %s1022_s19 }
  0xed   :  { %v365_v44 = vmul.f32 %v328_v35, %v246_v42  ;;  %1157 = vmatprep.subr.bf16.mxu1 %v407_v39  ;;  %p1222_p0 = scmp.ne.s32.totalorder %s1022_s19, %s1221_s20  ;;  %p1227_p2 = scmp.lt.s32.totalorder %s1221_s20, %s1221_s20 }
  0xee   :  { %1158 = vmatpush3.bf16.msra.mxu1 %v407_v39  ;;  %v860_v39 = vpop.permute.xlu0 %859 }
  0xef   :  { %v408_v46 = vpack.c.bf16 %v366_v41, %v365_v44  ;;  %v1145_v47 = vpop.f32.mrb[12].mxu0  ;;  %v1564_v44 = vpop.permute.xlu1 %864  ;;  %p1228_p3 = por %p1227_p2, %p1226_p1 }
  0xf0   :  { %v368_v48 = vmul.f32 %v1145_v47, %v343_v43  ;;  %v256_v49 = vpop.f32.mrb[13].mxu0 }
  0xf1   :  { %v367_v50 = vmul.f32 %v338_v45, %v256_v49  ;;  %1159 = vmatprep.subr.bf16.mxu1 %v408_v46  ;;  %p1229_p4 = pnand %p1228_p3, %p1222_p0 }
  0xf2   :  { %1160 = vmatpush3.bf16.msra.mxu1 %v408_v46 }
  0xf3   :  { %v409_v52 = vpack.c.bf16 %v368_v48, %v367_v50  ;;  %v1148_v53 = vpop.f32.mrb[14].mxu0 }
  0xf4   :  { %v370_v55 = vmul.f32 %v1148_v53, %v353_v51  ;;  %v266_v56 = vpop.f32.mrb[15].mxu0 }
  0xf5   :  { %v369_v57 = vmul.f32 %v348_v54, %v266_v56  ;;  %1161 = vmatprep.subr.bf16.mxu1 %v409_v52 }
  0xf6   :  { %1162 = vmatpush3.bf16.msra.mxu1 %v409_v52 }
  0xf7   :  { %v410_v58 = vpack.c.bf16 %v370_v55, %v369_v57  ;;  %v1185_v59 = vpop.f32.mrb[16].mxu0 }
  0xf8   :  { %v738_v60 = vpop.f32.mrb[17].mxu0  ;;  %v898_v32 = vmul.f32 %v1185_v59, %v825_v19 }
  0xf9   :  { %1163 = vmatprep.subr.bf16.mxu1 %v410_v58  ;;  %v897_v27 = vmul.f32 %v820_v18, %v738_v60 }
  0xfa   :  { %1164 = vmatpush3.bf16.msra.mxu1 %v410_v58  ;;  %v870_v58 = vpop.permute.xlu0 %869 }
  0xfb   :  { %v1188_v63 = vpop.f32.mrb[18].mxu0 }
  0xfc   :  { %v748_v0 = vpop.f32.mrb[19].mxu0  ;;  %v900_v29 = vmul.f32 %v1188_v63, %v835_v21 }
  0xfd   :  { %1166 = vmatmul.mubr.bf16.vlgmr.msra.gmra.mrb[0].mxu1 %v1214_v61  ;;  %v899_v25 = vmul.f32 %v830_v20, %v748_v0 }
  0xfe   :  { %1169 = vmatprep.mubr.bf16.mxu1 %v1215_v62 }
  0xff   :  { %v1525_v1 = vpop.f32.mrb[20].mxu0 }
 0x100   :  { %v758_v2 = vpop.f32.mrb[21].mxu0  ;;  %v902_v59 = vmul.f32 %v1525_v1, %v845_v23 }
 0x101   :  { %v901_v50 = vmul.f32 %v840_v22, %v758_v2 }
 0x103   :  { %v1194_v5 = vpop.f32.mrb[22].mxu0 }
 0x104   :  { %v768_v6 = vpop.f32.mrb[23].mxu0  ;;  %v904_v54 = vmul.f32 %v1194_v5, %v855_v26 }
 0x105   :  { %1170 = vmatmul.mubr.bf16.gmra.mrb[4].mxu1 %v1216_v3  ;;  %v903_v47 = vmul.f32 %v850_v24, %v768_v6  ;;  %v875_v3 = vpop.permute.xlu1 %874 }
 0x106   :  { %1173 = vmatprep.mubr.bf16.mxu1 %v1217_v4 }
 0x107   :  { %v1533_v7 = vpop.f32.mrb[24].mxu0 }
 0x108   :  { %v1535_v8 = vpop.f32.mrb[25].mxu0 }
 0x10b   :  { %v1543_v11 = vpop.f32.mrb[26].mxu0 }
 0x10c   :  { %v1545_v12 = vpop.f32.mrb[27].mxu0 }
 0x10d   :  { %1174 = vmatmul.mubr.bf16.gmra.mrb[8].mxu1 %v1218_v9  ;;  %v907_v1 = vmul.f32 %v870_v58, %v1545_v12  ;;  %v906_v12 = vmul.f32 %v1533_v7, %v1564_v44 }
 0x10e   :  { %1177 = vmatprep.mubr.bf16.mxu1 %v1219_v10 }
 0x10f   :  { %v1547_v13 = vpop.f32.mrb[28].mxu0 }
 0x110   :  { %v1549_v14 = vpop.f32.mrb[29].mxu0 }
 0x113   :  { %v1554_v16 = vpop.f32.mrb[30].mxu0 }
 0x114   :  { %v1556_v17 = vpop.f32.mrb[31].mxu0 }
 0x115   :  { %1178 = vmatmul.mubr.bf16.gmra.mrb[12].mxu1 %v1220_v15 }
 0x1d0   :  { %v1167_v28 = vpop.f32.mrb[0].mxu1 }
 0x1d1   :  { %v931_v30 = vadd.f32 %v1167_v28, %v899_v25  ;;  %v493_v31 = vpop.f32.mrb[1].mxu1 }
 0x1d2   :  { %v929_v34 = vadd.f32 %v897_v27, %v493_v31  ;;  %v1168_v35 = vpop.f32.mrb[2].mxu1 }
 0x1d3   :  { %v947_v36 = vmul.f32 %v931_v30, %v830_v20  ;;  %v932_v37 = vadd.f32 %v1168_v35, %v900_v29  ;;  %v496_v38 = vpop.f32.mrb[3].mxu1  ;;  %v880_v20 = vpop.permute.xlu0 %879 }
 0x1d4   :  { %v945_v40 = vmul.f32 %v929_v34, %v820_v18  ;;  %v930_v41 = vadd.f32 %v898_v32, %v496_v38  ;;  %v885_v30 = vpop.permute.xlu1 %884 }
 0x1d5   :  { %v970_v42 = vadd.f32 %v1561_v33, %v947_v36  ;;  %v948_v43 = vmul.f32 %v932_v37, %v835_v21  ;;  %v905_v21 = vmul.f32 %v860_v39, %v1535_v8 }
 0x1d6   :  { %v968_v45 = vadd.f32 %v1561_v33, %v945_v40  ;;  %v946_v46 = vmul.f32 %v930_v41, %v825_v19 }
 0x1d7   :  { %v986_v48 = vmax.f32 %v970_v42, 0.0  ;;  %v971_v49 = vadd.f32 %v1561_v33, %v948_v43  ;;  %v890_v40 = vpop.permute.xlu0 %889 }
 0x1d8   :  { %v984_v51 = vmax.f32 %v968_v45, 0.0  ;;  %v969_v52 = vadd.f32 %v1561_v33, %v946_v46  ;;  %v1171_v53 = vpop.f32.mrb[4].mxu1  ;;  %v911_v7 = vmul.f32 %v890_v40, %v1556_v17  ;;  %v895_v46 = vpop.permute.xlu1 %894 }
 0x1d9   :  { %1002 = vst [vmem:[#allocation3 + $0x10] sm:$0xff] %v986_v48  ;;  %v987_v55 = vmax.f32 %v971_v49, 0.0  ;;  %v935_v56 = vadd.f32 %v1171_v53, %v903_v47  ;;  %v509_v57 = vpop.f32.mrb[5].mxu1  ;;  %v909_v47 = vmul.f32 %v880_v20, %v1549_v14 }
 0x1da   :  { %1000 = vst [vmem:[#allocation3] sm:$0xff] %v984_v51  ;;  %v985_v60 = vmax.f32 %v969_v52, 0.0  ;;  %v933_v61 = vadd.f32 %v901_v50, %v509_v57  ;;  %v1172_v62 = vpop.f32.mrb[6].mxu1  ;;  %v912_v50 = vmul.f32 %v1554_v16, %v895_v46 }
 0x1db   :  { %1003 = vst [vmem:[#allocation3 + $0x18] sm:$0xff] %v987_v55  ;;  %v951_v63 = vmul.f32 %v935_v56, %v850_v24  ;;  %v936_v0 = vadd.f32 %v1172_v62, %v904_v54  ;;  %v512_v2 = vpop.f32.mrb[7].mxu1 }
 0x1dc   :  { %1001 = vst [vmem:[#allocation3 + $0x8] sm:$0xff] %v985_v60  ;;  %v949_v4 = vmul.f32 %v933_v61, %v840_v22  ;;  %v934_v6 = vadd.f32 %v902_v59, %v512_v2  ;;  %v908_v22 = vmul.f32 %v1543_v11, %v875_v3 }
 0x1dd   :  { %v974_v5 = vadd.f32 %v1561_v33, %v951_v63  ;;  %v952_v9 = vmul.f32 %v936_v0, %v855_v26 }
 0x1de   :  { %v972_v10 = vadd.f32 %v1561_v33, %v949_v4  ;;  %v950_v15 = vmul.f32 %v934_v6, %v845_v23 }
 0x1df   :  { %v990_v18 = vmax.f32 %v974_v5, 0.0  ;;  %v975_v19 = vadd.f32 %v1561_v33, %v952_v9 }
 0x1e0   :  { %v988_v24 = vmax.f32 %v972_v10, 0.0  ;;  %v973_v25 = vadd.f32 %v1561_v33, %v950_v15  ;;  %v1175_v27 = vpop.f32.mrb[8].mxu1 }
 0x1e1   :  { %1006 = vst [vmem:[#allocation3 + $0x30] sm:$0xff] %v990_v18  ;;  %v991_v28 = vmax.f32 %v975_v19, 0.0  ;;  %v939_v26 = vadd.f32 %v1175_v27, %v907_v1  ;;  %v525_v29 = vpop.f32.mrb[9].mxu1 }
 0x1e2   :  { %1004 = vst [vmem:[#allocation3 + $0x20] sm:$0xff] %v988_v24  ;;  %v989_v23 = vmax.f32 %v973_v25, 0.0  ;;  %v937_v31 = vadd.f32 %v905_v21, %v525_v29  ;;  %v1176_v32 = vpop.f32.mrb[10].mxu1 }
 0x1e3   :  { %1007 = vst [vmem:[#allocation3 + $0x38] sm:$0xff] %v991_v28  ;;  %v955_v8 = vmul.f32 %v939_v26, %v870_v58  ;;  %v940_v34 = vadd.f32 %v1176_v32, %v908_v22  ;;  %v528_v35 = vpop.f32.mrb[11].mxu1 }
 0x1e4   :  { %1005 = vst [vmem:[#allocation3 + $0x28] sm:$0xff] %v989_v23  ;;  %v953_v36 = vmul.f32 %v937_v31, %v860_v39  ;;  %v938_v37 = vadd.f32 %v906_v12, %v528_v35 }
 0x1e5   :  { %v978_v11 = vadd.f32 %v1561_v33, %v955_v8  ;;  %v956_v38 = vmul.f32 %v940_v34, %v875_v3 }
 0x1e6   :  { %v976_v41 = vadd.f32 %v1561_v33, %v953_v36  ;;  %v954_v42 = vmul.f32 %v938_v37, %v1564_v44  ;;  %v910_v44 = vmul.f32 %v1547_v13, %v885_v30 }
 0x1e7   :  { %v994_v43 = vmax.f32 %v978_v11, 0.0  ;;  %v979_v45 = vadd.f32 %v1561_v33, %v956_v38 }
 0x1e8   :  { %v992_v48 = vmax.f32 %v976_v41, 0.0  ;;  %v977_v39 = vadd.f32 %v1561_v33, %v954_v42  ;;  %v1179_v49 = vpop.f32.mrb[12].mxu1 }
 0x1e9   :  { %1010 = vst [vmem:[#allocation3 + $0x50] sm:$0xff] %v994_v43  ;;  %v995_v51 = vmax.f32 %v979_v45, 0.0  ;;  %v943_v52 = vadd.f32 %v1179_v49, %v911_v7  ;;  %v541_v53 = vpop.f32.mrb[13].mxu1 }
 0x1ea   :  { %1008 = vst [vmem:[#allocation3 + $0x40] sm:$0xff] %v992_v48  ;;  %v993_v17 = vmax.f32 %v977_v39, 0.0  ;;  %v941_v54 = vadd.f32 %v909_v47, %v541_v53  ;;  %v1180_v55 = vpop.f32.mrb[14].mxu1 }
 0x1eb   :  { %1011 = vst [vmem:[#allocation3 + $0x58] sm:$0xff] %v995_v51  ;;  %v959_v56 = vmul.f32 %v943_v52, %v890_v40  ;;  %v944_v57 = vadd.f32 %v1180_v55, %v912_v50  ;;  %v544_v14 = vpop.f32.mrb[15].mxu1 }
 0x1ec   :  { %1009 = vst [vmem:[#allocation3 + $0x48] sm:$0xff] %v993_v17  ;;  %v957_v58 = vmul.f32 %v941_v54, %v880_v20  ;;  %v942_v59 = vadd.f32 %v910_v44, %v544_v14 }
 0x1ed   :  { %v982_v60 = vadd.f32 %v1561_v33, %v959_v56  ;;  %v960_v16 = vmul.f32 %v944_v57, %v895_v46 }
 0x1ee   :  { %v980_v61 = vadd.f32 %v1561_v33, %v957_v58  ;;  %v958_v62 = vmul.f32 %v942_v59, %v885_v30 }
 0x1ef   :  { %v998_v13 = vmax.f32 %v982_v60, 0.0  ;;  %v983_v63 = vadd.f32 %v1561_v33, %v960_v16 }
 0x1f0   :  { %v996_v0 = vmax.f32 %v980_v61, 0.0  ;;  %v981_v2 = vadd.f32 %v1561_v33, %v958_v62 }
 0x1f1   :  { %1014 = vst [vmem:[#allocation3 + $0x70] sm:$0xff] %v998_v13  ;;  %v999_v3 = vmax.f32 %v983_v63, 0.0 }
 0x1f2   :  { %1012 = vst [vmem:[#allocation3 + $0x60] sm:$0xff] %v996_v0  ;;  %v997_v4 = vmax.f32 %v981_v2, 0.0 }
 0x1f3   :  { %1015 = vst [vmem:[#allocation3 + $0x78] sm:$0xff] %v999_v3 }
 0x1f4   :  { %1013 = vst [vmem:[#allocation3 + $0x68] sm:$0xff] %v997_v4 }
 0x1f5   :  { %1232 = shalt.err (!%p1229_p4)
}
 0x1f6   :  { %s1233_s22 = scalar_lea.hbm %s1611_s7, 2048 }
 0x1f7   :  { %p1234_p5 = scmp.ne.s32.totalorder %s1611_s7, %s1233_s22  ;;  %p1237_p6 = scmp.lt.u32.totalorder %s1233_s22, %s1611_s7 }
 0x1f9   :  { %p1239_p7 = pnand %p1237_p6, %p1234_p5 }
 0x1fb   :  { %1242 = shalt.err (!%p1239_p7)
}
 0x1fc   :  { %s1247_s26 = smov 128   ;;  %s1248_s27 = smov 8  }
 0x1fd   :  { %1027 = dma.vmem_to_hbm [thread:$0]  %s1022_s19, 2048, %s1611_s7, [#allocation4], %s1247_s26, %s1247_s26, %s1248_s27  }
 0x1fe   :  { %1243 = dma.done.wait [#allocation4], 2048  }
 0x1ff   :  { %1244 = vsyncadd [#allocation4], 4294965248 }
 0x200   :  { %1031 = vsyncpa [#allocation4], 1 }

</bundles_post_ra>
